<compile_context>
chip_gen: v7x
topology: tpu7x:2x2x1
jax: 0.10.0
libtpu: 0.0.40
codegen_flags: <defaults>
</compile_context>

<pallas_src>
import jax
import jax.numpy as jnp
from jax.experimental import pallas as pl
from jax.experimental.pallas import tpu as pltpu


def _round_up(x, m):
    return ((x + m - 1) // m) * m


def _pinn_kernel(xt_ref, w1_ref, b1_ref, w2_ref, b2_ref,
                 w3_ref, b3_ref, w4_ref, b4_ref, o_ref):
    # Whole hot path fused in VMEM for one batch tile.
    # Activations are (features, batch): batch on the lane axis (lane-dense).
    xt = xt_ref[...]                                                    # (2, T)
    x0 = xt[0:1, :]                                                     # (1, T)
    x1 = xt[1:2, :]                                                     # (1, T)

    # Layer 1 (K=2): VPU broadcast-FMA instead of a near-empty MXU matmul.
    h = jnp.tanh(w1_ref[:, 0:1] * x0 + w1_ref[:, 1:2] * x1 + b1_ref[...])   # (40, T)

    # Layers 2-4 stay on the MXU (K=40).
    h = jnp.tanh(jnp.dot(w2_ref[...], h,
                         preferred_element_type=jnp.float32) + b2_ref[...])  # (40, T)
    h = jnp.tanh(jnp.dot(w3_ref[...], h,
                         preferred_element_type=jnp.float32) + b3_ref[...])  # (40, T)
    y = jnp.dot(w4_ref[...], h,
                preferred_element_type=jnp.float32) + b4_ref[...]            # (8, T)
    o_ref[...] = y.astype(o_ref.dtype)


def _plan_tile(n, tile_b):
    """Pick the batch tile (multiple of 128) and padded batch length.

    Guarantees grid >= 2 whenever the lane-rounded batch is >= 256 so the
    "parallel" grid axis can shard across v7x's two TensorCores, while still
    using a large tile (default 8192) for big batches to amortize the fixed
    per-grid-step overhead and MXU weight pushes.
    """
    assert tile_b % 128 == 0, "batch tile must be a multiple of 128 lanes"
    n128 = _round_up(max(n, 1), 128)
    if n128 >= 256:
        half = _round_up(pl.cdiv(n128, 2), 128)   # at least 2 grid steps
        tile = min(tile_b, half)
    else:
        tile = n128
    n_pad = _round_up(n128, tile)
    return tile, n_pad


def _prep_params(params):
    """PyTorch-convention params -> kernel operands (w: (out,in), b: (out,1),
    output layer padded 5 -> 8 sublanes for an aligned (8, tile) store)."""
    w1, w2, w3, w4 = params["w1"], params["w2"], params["w3"], params["w4"]
    b1 = params["b1"].reshape(-1, 1).astype(jnp.float32)
    b2 = params["b2"].reshape(-1, 1).astype(jnp.float32)
    b3 = params["b3"].reshape(-1, 1).astype(jnp.float32)
    d_out = w4.shape[0]
    d_out_pad = _round_up(d_out, 8)
    w4p = jnp.zeros((d_out_pad, w4.shape[1]), jnp.float32).at[:d_out].set(w4)
    b4p = jnp.zeros((d_out_pad, 1), jnp.float32).at[:d_out].set(
        params["b4"].reshape(-1, 1))
    return (w1.astype(jnp.float32), b1, w2.astype(jnp.float32), b2,
            w3.astype(jnp.float32), b3, w4p, b4p), d_out, d_out_pad


def pinn_forward_fm(xt, params, *, tile):
    """Feature-major fast path (no wrapper relayouts).

    xt: (2, n_pad) float32 with n_pad a multiple of `tile` (tile % 128 == 0).
    Returns the feature-major output (8, n_pad); rows [0:5] are the real
    outputs.  Use this directly inside a training loop where the collocation
    points are fixed, so the pad/transpose of x is paid once.
    """
    d_in, n_pad = xt.shape
    assert d_in == 2 and tile % 128 == 0 and n_pad % tile == 0
    grid = n_pad // tile

    (w1, b1, w2, b2, w3, b3, w4p, b4p), _, d_out_pad = _prep_params(params)

    def full(shape):
        # Small constant operands: full block, constant index_map -> resident
        # in VMEM across all grid steps.
        return pl.BlockSpec(shape, lambda i: (0,) * len(shape))

    flops = 2 * n_pad * (2 * 40 + 40 * 40 + 40 * 40 + 40 * d_out_pad)
    transcendentals = 3 * 40 * n_pad
    bytes_accessed = 4 * ((2 + d_out_pad) * n_pad) + 4 * (
        w1.size + w2.size + w3.size + w4p.size + 3 * 40 + d_out_pad)

    # VMEM budget: double-buffered I/O blocks + a few live (40, tile) f32
    # temporaries + the (tiny) resident weights.  Floor at 32 MiB (within every
    # generation's physical VMEM), cap at 56 MiB so v7x's 64 MiB pool keeps
    # headroom; v5e stays well under its budget at the default tile.
    per_step_io = 4 * tile * (2 + d_out_pad)
    per_step_act = 4 * tile * 40 * 3
    weight_bytes = 4 * (w1.size + w2.size + w3.size + w4p.size + 3 * 40 + d_out_pad)
    est = 2 * per_step_io + per_step_act + 2 * weight_bytes
    vmem_limit = int(min(56 * 2**20, max(32 * 2**20, 2 * est)))

    return pl.pallas_call(
        _pinn_kernel,
        out_shape=jax.ShapeDtypeStruct((d_out_pad, n_pad), jnp.float32),
        grid_spec=pltpu.PrefetchScalarGridSpec(
            num_scalar_prefetch=0,
            grid=(grid,),
            in_specs=[
                pl.BlockSpec((2, tile), lambda i: (0, i)),
                full(w1.shape), full(b1.shape),
                full(w2.shape), full(b2.shape),
                full(w3.shape), full(b3.shape),
                full(w4p.shape), full(b4p.shape),
            ],
            out_specs=pl.BlockSpec((d_out_pad, tile), lambda i: (0, i)),
        ),
        compiler_params=pltpu.CompilerParams(
            dimension_semantics=("parallel",),
            vmem_limit_bytes=vmem_limit),
        cost_estimate=pl.CostEstimate(
            flops=flops,
            transcendentals=transcendentals,
            bytes_accessed=bytes_accessed),
    )(xt, w1, b1, w2, b2, w3, b3, w4p, b4p)


def pinn_forward(x, params, *, tile_b=8192):
    """Row-major convenience wrapper, semantics identical to the PyTorch module.

    x: (N, 2) float32 -> (N, 5) float32.
    For training loops with fixed x, precompute the feature-major input once
    and call `pinn_forward_fm` directly to skip the per-call pad/transpose.
    """
    n, d_in = x.shape
    assert d_in == 2
    tile, n_pad = _plan_tile(n, tile_b)

    # Feature-major input: (2, n_pad), batch on the lane axis.
    x_pad = jnp.pad(x.astype(jnp.float32), ((0, n_pad - n), (0, 0)))
    xt = x_pad.T

    out_t = pinn_forward_fm(xt, params, tile=tile)

    d_out = params["w4"].shape[0]
    # Back to row-major (N, 5); drop batch padding and the padded output rows.
    return out_t.T[:n, :d_out]


def init_params(key):
    """Xavier-normal weights (nn.init.xavier_normal_), zero biases.
    Stored in PyTorch nn.Linear convention: w (out, in), b (out,)."""
    dims = [(2, 40), (40, 40), (40, 40), (40, 5)]   # (fan_in, fan_out)
    params = {}
    for idx, (fan_in, fan_out) in enumerate(dims, start=1):
        key, sub = jax.random.split(key)
        std = (2.0 / (fan_in + fan_out)) ** 0.5
        params[f"w{idx}"] = std * jax.random.normal(
            sub, (fan_out, fan_in), dtype=jnp.float32)
        params[f"b{idx}"] = jnp.zeros((fan_out,), dtype=jnp.float32)
    return params


def _ref_fwd(x, p):
    h = jnp.tanh(x @ p["w1"].T + p["b1"])
    h = jnp.tanh(h @ p["w2"].T + p["b2"])
    h = jnp.tanh(h @ p["w3"].T + p["b3"])
    return h @ p["w4"].T + p["b4"]


if __name__ == "__main__":
    key = jax.random.PRNGKey(0)
    params = init_params(key)

    # Small deterministic batch: 16 points, 2 coordinates each (single grid step).
    x_small = jax.random.normal(jax.random.PRNGKey(1), (16, 2), dtype=jnp.float32)
    out_small = jax.block_until_ready(pinn_forward(x_small, params))
    assert out_small.shape == (16, 5)
    assert jnp.allclose(out_small, _ref_fwd(x_small, params), atol=1e-5, rtol=1e-5)

    # A non-multiple-of-128 batch exercises the padding path and the grid>=2
    # split (dual-TensorCore sharding on v7x).
    x_med = jax.random.normal(jax.random.PRNGKey(2), (300, 2), dtype=jnp.float32)
    out_med = jax.block_until_ready(pinn_forward(x_med, params))
    assert out_med.shape == (300, 5)
    assert jnp.allclose(out_med, _ref_fwd(x_med, params), atol=1e-5, rtol=1e-5)

    # Feature-major fast path (what a training loop would call repeatedly).
    tile, n_pad = _plan_tile(300, 8192)
    xt = jnp.pad(x_med, ((0, n_pad - 300), (0, 0))).T
    out_fm = jax.block_until_ready(pinn_forward_fm(xt, params, tile=tile))
    assert out_fm.shape[0] == 8
    assert jnp.allclose(out_fm.T[:300, :5], _ref_fwd(x_med, params),
                        atol=1e-5, rtol=1e-5)

    print("KERNEL_OK")
</pallas_src>

<mosaic_0001>
module attributes {stable_mosaic.version = 11 : i64} {
  func.func @_pinn_kernel(%arg0: i32, %arg1: memref<2x128xf32, #tpu.memory_space<vmem>>, %arg2: memref<40x2xf32, #tpu.memory_space<vmem>>, %arg3: memref<40x1xf32, #tpu.memory_space<vmem>>, %arg4: memref<40x40xf32, #tpu.memory_space<vmem>>, %arg5: memref<40x1xf32, #tpu.memory_space<vmem>>, %arg6: memref<40x40xf32, #tpu.memory_space<vmem>>, %arg7: memref<40x1xf32, #tpu.memory_space<vmem>>, %arg8: memref<8x40xf32, #tpu.memory_space<vmem>>, %arg9: memref<8x1xf32, #tpu.memory_space<vmem>>, %arg10: memref<8x128xf32, #tpu.memory_space<vmem>>) attributes {dimension_semantics = [#tpu.dimension_semantics<parallel>], iteration_bounds = array<i64: 1>, scalar_prefetch = 0 : i64, scratch_operands = 0 : i64, tpu.core_type = #tpu.core_type<tc>, window_params = [{transform_indices = @transform_0, window_bounds = array<i64: 2, 128>}, {pipeline_mode = #tpu.pipeline_mode<synchronous>, transform_indices = @transform_1, window_bounds = array<i64: 40, 2>}, {pipeline_mode = #tpu.pipeline_mode<synchronous>, transform_indices = @transform_2, window_bounds = array<i64: 40, 1>}, {pipeline_mode = #tpu.pipeline_mode<synchronous>, transform_indices = @transform_3, window_bounds = array<i64: 40, 40>}, {pipeline_mode = #tpu.pipeline_mode<synchronous>, transform_indices = @transform_4, window_bounds = array<i64: 40, 1>}, {pipeline_mode = #tpu.pipeline_mode<synchronous>, transform_indices = @transform_5, window_bounds = array<i64: 40, 40>}, {pipeline_mode = #tpu.pipeline_mode<synchronous>, transform_indices = @transform_6, window_bounds = array<i64: 40, 1>}, {pipeline_mode = #tpu.pipeline_mode<synchronous>, transform_indices = @transform_7, window_bounds = array<i64: 8, 40>}, {pipeline_mode = #tpu.pipeline_mode<synchronous>, transform_indices = @transform_8, window_bounds = array<i64: 8, 1>}, {transform_indices = @transform_9, window_bounds = array<i64: 8, 128>}]} {
    %c0 = arith.constant 0 : index
    %c0_0 = arith.constant 0 : index
    %0 = vector.load %arg1[%c0, %c0_0] : memref<2x128xf32, #tpu.memory_space<vmem>>, vector<2x128xf32>
    %1 = vector.extract_strided_slice %0 {offsets = [0, 0], sizes = [1, 128], strides = [1, 1]} : vector<2x128xf32> to vector<1x128xf32>
    %2 = vector.extract_strided_slice %0 {offsets = [1, 0], sizes = [1, 128], strides = [1, 1]} : vector<2x128xf32> to vector<1x128xf32>
    %c0_1 = arith.constant 0 : index
    %c0_2 = arith.constant 0 : index
    %3 = vector.load %arg2[%c0_1, %c0_2] : memref<40x2xf32, #tpu.memory_space<vmem>>, vector<40x1xf32>
    %4 = vector.broadcast %3 : vector<40x1xf32> to vector<40x128xf32>
    %5 = vector.broadcast %1 : vector<1x128xf32> to vector<40x128xf32>
    %6 = arith.mulf %4, %5 : vector<40x128xf32>
    %c0_3 = arith.constant 0 : index
    %c1 = arith.constant 1 : index
    %7 = vector.load %arg2[%c0_3, %c1] : memref<40x2xf32, #tpu.memory_space<vmem>>, vector<40x1xf32>
    %8 = vector.broadcast %7 : vector<40x1xf32> to vector<40x128xf32>
    %9 = vector.broadcast %2 : vector<1x128xf32> to vector<40x128xf32>
    %10 = arith.mulf %8, %9 : vector<40x128xf32>
    %11 = arith.addf %6, %10 : vector<40x128xf32>
    %c0_4 = arith.constant 0 : index
    %c0_5 = arith.constant 0 : index
    %12 = vector.load %arg3[%c0_4, %c0_5] : memref<40x1xf32, #tpu.memory_space<vmem>>, vector<40x1xf32>
    %13 = vector.broadcast %12 : vector<40x1xf32> to vector<40x128xf32>
    %14 = arith.addf %11, %13 : vector<40x128xf32>
    %15 = math.tanh %14 : vector<40x128xf32>
    %c0_6 = arith.constant 0 : index
    %c0_7 = arith.constant 0 : index
    %16 = vector.load %arg4[%c0_6, %c0_7] : memref<40x40xf32, #tpu.memory_space<vmem>>, vector<40x40xf32>
    %cst = arith.constant dense<0.000000e+00> : vector<40x128xf32>
    %17 = tpu.matmul %16, %15, %cst {dimension_numbers = #tpu.dot_dimension_numbers<[1], [0], [0], [1], [0, 0, 1, 1], [], []>} : vector<40x40xf32>, vector<40x128xf32>, vector<40x128xf32> -> vector<40x128xf32>
    %c0_8 = arith.constant 0 : index
    %c0_9 = arith.constant 0 : index
    %18 = vector.load %arg5[%c0_8, %c0_9] : memref<40x1xf32, #tpu.memory_space<vmem>>, vector<40x1xf32>
    %19 = vector.broadcast %18 : vector<40x1xf32> to vector<40x128xf32>
    %20 = arith.addf %17, %19 : vector<40x128xf32>
    %21 = math.tanh %20 : vector<40x128xf32>
    %c0_10 = arith.constant 0 : index
    %c0_11 = arith.constant 0 : index
    %22 = vector.load %arg6[%c0_10, %c0_11] : memref<40x40xf32, #tpu.memory_space<vmem>>, vector<40x40xf32>
    %cst_12 = arith.constant dense<0.000000e+00> : vector<40x128xf32>
    %23 = tpu.matmul %22, %21, %cst_12 {dimension_numbers = #tpu.dot_dimension_numbers<[1], [0], [0], [1], [0, 0, 1, 1], [], []>} : vector<40x40xf32>, vector<40x128xf32>, vector<40x128xf32> -> vector<40x128xf32>
    %c0_13 = arith.constant 0 : index
    %c0_14 = arith.constant 0 : index
    %24 = vector.load %arg7[%c0_13, %c0_14] : memref<40x1xf32, #tpu.memory_space<vmem>>, vector<40x1xf32>
    %25 = vector.broadcast %24 : vector<40x1xf32> to vector<40x128xf32>
    %26 = arith.addf %23, %25 : vector<40x128xf32>
    %27 = math.tanh %26 : vector<40x128xf32>
    %c0_15 = arith.constant 0 : index
    %c0_16 = arith.constant 0 : index
    %28 = vector.load %arg8[%c0_15, %c0_16] : memref<8x40xf32, #tpu.memory_space<vmem>>, vector<8x40xf32>
    %cst_17 = arith.constant dense<0.000000e+00> : vector<8x128xf32>
    %29 = tpu.matmul %28, %27, %cst_17 {dimension_numbers = #tpu.dot_dimension_numbers<[1], [0], [0], [1], [0, 0, 1, 1], [], []>} : vector<8x40xf32>, vector<40x128xf32>, vector<8x128xf32> -> vector<8x128xf32>
    %c0_18 = arith.constant 0 : index
    %c0_19 = arith.constant 0 : index
    %30 = vector.load %arg9[%c0_18, %c0_19] : memref<8x1xf32, #tpu.memory_space<vmem>>, vector<8x1xf32>
    %31 = vector.broadcast %30 : vector<8x1xf32> to vector<8x128xf32>
    %32 = arith.addf %29, %31 : vector<8x128xf32>
    %c0_20 = arith.constant 0 : index
    %c0_21 = arith.constant 0 : index
    %33 = vector.load %arg10[%c0_20, %c0_21] : memref<8x128xf32, #tpu.memory_space<vmem>>, vector<8x128xf32>
    tpu.vector_store %arg10[%c0_20, %c0_21], %32 {strides = array<i32>} : memref<8x128xf32, #tpu.memory_space<vmem>>, vector<8x128xf32>,
    return
  }
  func.func @transform_0(%arg0: i32) -> (i32, i32) {
    %c0_i32 = arith.constant 0 : i32
    %c0_i32_0 = arith.constant 0 : i32
    return %c0_i32, %arg0 : i32, i32
  }
  func.func @transform_1(%arg0: i32) -> (i32, i32) {
    %c0_i32 = arith.constant 0 : i32
    %c0_i32_0 = arith.constant 0 : i32
    %c0_i32_1 = arith.constant 0 : i32
    return %c0_i32, %c0_i32_0 : i32, i32
  }
  func.func @transform_2(%arg0: i32) -> (i32, i32) {
    %c0_i32 = arith.constant 0 : i32
    %c0_i32_0 = arith.constant 0 : i32
    %c0_i32_1 = arith.constant 0 : i32
    return %c0_i32, %c0_i32_0 : i32, i32
  }
  func.func @transform_3(%arg0: i32) -> (i32, i32) {
    %c0_i32 = arith.constant 0 : i32
    %c0_i32_0 = arith.constant 0 : i32
    %c0_i32_1 = arith.constant 0 : i32
    return %c0_i32, %c0_i32_0 : i32, i32
  }
  func.func @transform_4(%arg0: i32) -> (i32, i32) {
    %c0_i32 = arith.constant 0 : i32
    %c0_i32_0 = arith.constant 0 : i32
    %c0_i32_1 = arith.constant 0 : i32
    return %c0_i32, %c0_i32_0 : i32, i32
  }
  func.func @transform_5(%arg0: i32) -> (i32, i32) {
    %c0_i32 = arith.constant 0 : i32
    %c0_i32_0 = arith.constant 0 : i32
    %c0_i32_1 = arith.constant 0 : i32
    return %c0_i32, %c0_i32_0 : i32, i32
  }
  func.func @transform_6(%arg0: i32) -> (i32, i32) {
    %c0_i32 = arith.constant 0 : i32
    %c0_i32_0 = arith.constant 0 : i32
    %c0_i32_1 = arith.constant 0 : i32
    return %c0_i32, %c0_i32_0 : i32, i32
  }
  func.func @transform_7(%arg0: i32) -> (i32, i32) {
    %c0_i32 = arith.constant 0 : i32
    %c0_i32_0 = arith.constant 0 : i32
    %c0_i32_1 = arith.constant 0 : i32
    return %c0_i32, %c0_i32_0 : i32, i32
  }
  func.func @transform_8(%arg0: i32) -> (i32, i32) {
    %c0_i32 = arith.constant 0 : i32
    %c0_i32_0 = arith.constant 0 : i32
    %c0_i32_1 = arith.constant 0 : i32
    return %c0_i32, %c0_i32_0 : i32, i32
  }
  func.func @transform_9(%arg0: i32) -> (i32, i32) {
    %c0_i32 = arith.constant 0 : i32
    %c0_i32_0 = arith.constant 0 : i32
    return %c0_i32, %arg0 : i32, i32
  }
}

</mosaic_0001>

<bundles_post_ra>
// kernel: tpu_custom_call.1
= control target key start
LH: loop header
LB: loop body
LE: loop exit
PB: predicated region body
PF: predicated region fallthrough
CT: control target
= control target key end

     0   :  { %v719_v2 = vmov 1   ;;  %s928_s0 = inlined_call_operand.vmem [shape: f32[2,128], index: 0, kind: input, shape index: {}]   ;;  %s929_s1 = inlined_call_operand.vmem [shape: f32[40,2], index: 1, kind: input, shape index: {}]   ;;  %s930_s2 = inlined_call_operand.vmem [shape: f32[40,1], index: 2, kind: input, shape index: {}]   ;;  %s931_s3 = inlined_call_operand.vmem [shape: f32[40,40], index: 3, kind: input, shape index: {}]   ;;  %s932_s4 = inlined_call_operand.vmem [shape: f32[40,1], index: 4, kind: input, shape index: {}]   ;;  %s933_s5 = inlined_call_operand.vmem [shape: f32[40,40], index: 5, kind: input, shape index: {}]   ;;  %s934_s6 = inlined_call_operand.vmem [shape: f32[40,1], index: 6, kind: input, shape index: {}]   ;;  %s935_s7 = inlined_call_operand.vmem [shape: f32[8,40], index: 7, kind: input, shape index: {}]   ;;  %s936_s8 = inlined_call_operand.vmem [shape: f32[8,1], index: 8, kind: input, shape index: {}]   ;;  %s937_s9 = inlined_call_operand.hbm [shape: f32[8,128], index: 9, kind: output, shape index: {}]  }
   0x1   :  { %v36_v0 = vld [vmem:[%s929_s1 + $0x10] sm:$0xff]  ;;  %v34_v1 = vld [vmem:[%s929_s1] sm:$0xff]  ;;  %659 = vset.pattern.permute.xlu0 %v719_v2  ;;  %657 = vset.pattern.permute.xlu1 %v719_v2  ;;  %v35_v3 = vld [vmem:[%s929_s1 + $0x8] sm:$0xff] }
   0x2   :  { %82 = vperm.xlu0 %659, %v36_v0   ;;  %74 = vperm.xlu1 %657, %v34_v1  }
   0x3   :  { %14 = vsyncpa [#allocation3], 0  ;;  %v720_v4 = vmov 0   ;;  %v37_v5 = vld [vmem:[%s929_s1 + $0x18] sm:$0xff]  ;;  %v108_v6 = vld [vmem:[%s930_s2 + $0x8] sm:$0xff]  ;;  %v721_v14 = vmov 0.0|0.0   ;;  %v64_v25 = vlaneseq }
   0x4   :  { %v107_v7 = vld [vmem:[%s930_s2] sm:$0xff]  ;;  %v109_v9 = vld [vmem:[%s930_s2 + $0x10] sm:$0xff]  ;;  %v110_v11 = vld [vmem:[%s930_s2 + $0x18] sm:$0xff]  ;;  %633 = vmatprep.subr.bf16.mxu0 %v721_v14  ;;  %639 = vmatprep.subr.bf16.mxu1 %v721_v14  ;;  %vm722_vm0 = vmmov 0   ;;  %v723_v18 = vmov 0.0   ;;  %vm182_vm1 = vcmask 326656  }
   0x5   :  { %v38_v8 = vld [vmem:[%s929_s1 + $0x20] sm:$0xff]  ;;  %v153_v12 = vld [vmem:[%s932_s4 + $0x8] sm:$0xff]  ;;  %v155_v13 = vld [vmem:[%s932_s4 + $0x18] sm:$0xff]  ;;  %580 = vmatprep.mubr.msk.f32.mxu0 %vm722_vm0, %v723_v18  ;;  %605 = vmatprep.mubr.msk.f32.mxu1 %vm722_vm0, %v723_v18  ;;  %v65_v28 = vshrl.u32 %v64_v25, 7  ;;  %s724_s23 = smov [#allocation2]  }
   0x6   :  { %660 = vset.pattern.permute.xlu0 %v720_v4  ;;  %78 = vperm.xlu1 %657, %v35_v3   ;;  %v111_v10 = vld [vmem:[%s930_s2 + $0x20] sm:$0xff]  ;;  %v300_v16 = vld [vmem:[%s934_s6 + $0x10] sm:$0xff]  ;;  %v299_v22 = vld [vmem:[%s934_s6 + $0x8] sm:$0xff]  ;;  %s525_s24 = sshll.u32 %s724_s23, 4  ;;  %s526_s24 = int_to_ptr.vmem [resolvable:$true] %s525_s24 }
   0x7   :  { %41 = vperm.xlu0 %660, %v34_v1   ;;  %v298_v15 = vld [vmem:[%s934_s6] sm:$0xff]  ;;  %v154_v20 = vld [vmem:[%s932_s4 + $0x10] sm:$0xff]  ;;  %v301_v23 = vld [vmem:[%s934_s6 + $0x18] sm:$0xff]  ;;  %v66_v31 = vsub.s32 0, %v65_v28  ;;  %v95_v32 = vsub.s32 1, %v65_v28  ;;  %s695_s25 = scalar_lea.vmem %s526_s24, 128  ;;  %p700_p1 = scmp.lt.s32.totalorder %s526_s24, %s526_s24 }
   0x8   :  { %v302_v17 = vld [vmem:[%s934_s6 + $0x20] sm:$0xff]  ;;  %p696_p0 = scmp.ne.s32.totalorder %s526_s24, %s695_s25  ;;  %p701_p2 = scmp.lt.s32.totalorder %s695_s25, %s695_s25 }
   0x9   :  { %v152_v19 = vld [vmem:[%s932_s4] sm:$0xff] }
   0xa   :  { %658 = vset.pattern.permute.xlu1 %v720_v4  ;;  %v156_v21 = vld [vmem:[%s932_s4 + $0x20] sm:$0xff]  ;;  %p702_p3 = por %p701_p2, %p700_p1 }
   0xb   :  { %46 = vperm.xlu0 %660, %v35_v3   ;;  %56 = vperm.xlu1 %658, %v37_v5   ;;  %v439_v24 = vld [vmem:[%s936_s8] sm:$0xff] }
   0xc   :  { %v33_v33 = vld [vmem:[%s928_s0] sm:$0x3]  ;;  %p703_p4 = pnand %p702_p3, %p696_p0 }
   0xd   :  { %v67_v36 = vrot.slane %v33_v33, %v66_v31  ;;  %v96_v37 = vrot.slane %v33_v33, %v95_v32 }
   0xf   :  { %51 = vperm.xlu0 %660, %v36_v0   ;;  %661 = vset.pattern.permute.xlu1 %v719_v2 }
  0x10   :  { %86 = vperm.xlu1 %661, %v37_v5  }
  0x13   :  { %119 = vperm.xlu0 %660, %v108_v6  }
  0x14   :  { %662 = vset.pattern.permute.xlu1 %v720_v4 }
  0x15   :  { %114 = vperm.xlu1 %662, %v107_v7  }
  0x17   :  { %61 = vperm.xlu0 %660, %v38_v8  }
  0x19   :  { %124 = vperm.xlu1 %662, %v109_v9   ;;  %v147_v9 = vld [vmem:[%s931_s3] sm:$0xff] }
  0x1b   :  { %134 = vperm.xlu0 %660, %v111_v10  }
  0x1d   :  { %129 = vperm.xlu1 %662, %v110_v11   ;;  %v148_v11 = vld [vmem:[%s931_s3 + $0x8] sm:$0xff] }
  0x1f   :  { %164 = vperm.xlu0 %660, %v153_v12   ;;  %v149_v12 = vld [vmem:[%s931_s3 + $0x10] sm:$0xff] }
  0x21   :  { %663 = vset.pattern.permute.xlu1 %v719_v2 }
  0x22   :  { %90 = vperm.xlu1 %663, %v38_v8  }
  0x23   :  { %174 = vperm.xlu0 %660, %v155_v13   ;;  %v150_v13 = vld [vmem:[%s931_s3 + $0x18] sm:$0xff] }
  0x26   :  { %664 = vset.pattern.permute.xlu1 %v720_v4 }
  0x27   :  { %305 = vperm.xlu0 %660, %v298_v15   ;;  %159 = vperm.xlu1 %664, %v152_v19   ;;  %v151_v15 = vld [vmem:[%s931_s3 + $0x20] sm:$0xff] }
  0x2b   :  { %315 = vperm.xlu0 %660, %v300_v16   ;;  %169 = vperm.xlu1 %664, %v154_v20  }
  0x2f   :  { %325 = vperm.xlu0 %660, %v302_v17   ;;  %179 = vperm.xlu1 %664, %v156_v21  }
  0x33   :  { %310 = vperm.xlu1 %664, %v299_v22  }
  0x37   :  { %320 = vperm.xlu1 %664, %v301_v23  }
  0x3b   :  { %442 = vperm.xlu1 %664, %v439_v24  }
  0x81   :  { %v75_v26 = vpop.permute.xlu1 %74  ;;  %v83_v27 = vpop.permute.xlu0 %82 }
  0x82   :  { %v97_v43 = vmul.f32 %v96_v37, %v75_v26  ;;  %v99_v51 = vmul.f32 %v96_v37, %v83_v27 }
  0x85   :  { %v79_v29 = vpop.permute.xlu1 %78 }
  0x86   :  { %v42_v30 = vpop.permute.xlu0 %41  ;;  %v98_v40 = vmul.f32 %v96_v37, %v79_v29 }
  0x87   :  { %v68_v41 = vmul.f32 %v67_v36, %v42_v30 }
  0x89   :  { %v102_v47 = vadd.f32 %v97_v43, %v68_v41  ;;  %v293_v43 = vld [vmem:[%s933_s5] sm:$0xff] }
  0x8a   :  { %v47_v34 = vpop.permute.xlu0 %46  ;;  %v57_v35 = vpop.permute.xlu1 %56 }
  0x8b   :  { %v69_v38 = vmul.f32 %v67_v36, %v47_v34  ;;  %v71_v55 = vmul.f32 %v67_v36, %v57_v35 }
  0x8d   :  { %v103_v44 = vadd.f32 %v98_v40, %v69_v38 }
  0x8e   :  { %v52_v39 = vpop.permute.xlu0 %51 }
  0x8f   :  { %v87_v42 = vpop.permute.xlu1 %86  ;;  %v70_v48 = vmul.f32 %v67_v36, %v52_v39 }
  0x90   :  { %v100_v52 = vmul.f32 %v96_v37, %v87_v42 }
  0x91   :  { %v104_v54 = vadd.f32 %v99_v51, %v70_v48  ;;  %v297_v48 = vld [vmem:[%s933_s5 + $0x20] sm:$0xff] }
  0x92   :  { %v120_v45 = vpop.permute.xlu0 %119  ;;  %v105_v57 = vadd.f32 %v100_v52, %v71_v55 }
  0x93   :  { %v138_v46 = vadd.f32 %v120_v45, %v103_v44  ;;  %v294_v45 = vld [vmem:[%s933_s5 + $0x8] sm:$0xff] }
  0x94   :  { %v115_v49 = vpop.permute.xlu1 %114 }
  0x95   :  { %v137_v50 = vadd.f32 %v115_v49, %v102_v47  ;;  %665 = vtanh.f32 %v138_v46  ;;  %v295_v46 = vld [vmem:[%s933_s5 + $0x10] sm:$0xff]  ;;  %v296_v47 = vld [vmem:[%s933_s5 + $0x18] sm:$0xff] }
  0x96   :  { %v62_v60 = vpop.permute.xlu0 %61 }
  0x97   :  { %667 = vtanh.f32 %v137_v50  ;;  %v72_v0 = vmul.f32 %v67_v36, %v62_v60 }
  0x98   :  { %v125_v53 = vpop.permute.xlu1 %124 }
  0x99   :  { %v139_v56 = vadd.f32 %v125_v53, %v104_v54 }
  0x9a   :  { %v135_v4 = vpop.permute.xlu0 %134 }
  0x9b   :  { %669 = vtanh.f32 %v139_v56 }
  0x9c   :  { %v130_v58 = vpop.permute.xlu1 %129 }
  0x9d   :  { %v140_v59 = vadd.f32 %v130_v58, %v105_v57 }
  0x9e   :  { %v165_v21 = vpop.permute.xlu0 %164 }
  0x9f   :  { %671 = vtanh.f32 %v140_v59  ;;  %v666_v61 = vpop.eup %665 }
  0xa1   :  { %v668_v62 = vpop.eup %667  ;;  %v91_v63 = vpop.permute.xlu1 %90 }
  0xa2   :  { %v101_v1 = vmul.f32 %v96_v37, %v91_v63  ;;  %v634_v2 = vpack.c.bf16 %v666_v61, %v668_v62  ;;  %v175_v29 = vpop.permute.xlu0 %174 }
  0xa4   :  { %v106_v3 = vadd.f32 %v101_v1, %v72_v0  ;;  %635 = vmatpush3.bf16.msra.mxu0 %v634_v2 }
  0xa5   :  { %636 = vmatprep.subr.bf16.mxu0 %v721_v14  ;;  %v670_v6 = vpop.eup %669 }
  0xa6   :  { %v141_v5 = vadd.f32 %v135_v4, %v106_v3  ;;  %v160_v17 = vpop.permute.xlu1 %159  ;;  %v306_v50 = vpop.permute.xlu0 %305 }
  0xa8   :  { %673 = vtanh.f32 %v141_v5 }
  0xa9   :  { %v672_v7 = vpop.eup %671 }
  0xaa   :  { %v637_v8 = vpack.c.bf16 %v672_v7, %v670_v6  ;;  %v170_v26 = vpop.permute.xlu1 %169  ;;  %v316_v58 = vpop.permute.xlu0 %315 }
  0xac   :  { %638 = vmatpush3.bf16.msra.mxu0 %v637_v8 }
  0xad   :  { %578 = vmatprep.subr.mxu0 %v723_v18 }
  0xae   :  { %v180_v34 = vpop.permute.xlu1 %179  ;;  %v326_v2 = vpop.permute.xlu0 %325 }
  0xb2   :  { %v674_v10 = vpop.eup %673  ;;  %v311_v53 = vpop.permute.xlu1 %310 }
  0xb3   :  { %579 = vmatpush3.msra.mxu0 %v674_v10 }
  0xb4   :  { %581 = vmatmul.mubr.msk.f32.vlgmr.msra.gmra.mrb[0].mxu0 %vm182_vm1, %v147_v9  ;;  %645 = vmatprep.subr.bf16.mxu0 %v721_v14 }
  0xb5   :  { %583 = vmatprep.mubr.msk.f32.mxu0 %vm722_vm0, %v723_v18 }
  0xb6   :  { %v321_v61 = vpop.permute.xlu1 %320 }
  0xb8   :  { %584 = vmatmul.mubr.msk.f32.gmra.mrb[2].mxu0 %vm182_vm1, %v148_v11  ;;  %v438_v11 = vld [vmem:[%s935_s7] sm:$0xff] }
  0xb9   :  { %586 = vmatprep.mubr.msk.f32.mxu0 %vm722_vm0, %v723_v18 }
  0xbc   :  { %587 = vmatmul.mubr.msk.f32.gmra.mrb[4].mxu0 %vm182_vm1, %v149_v12 }
  0xbd   :  { %589 = vmatprep.mubr.msk.f32.mxu0 %vm722_vm0, %v723_v18 }
  0xc0   :  { %590 = vmatmul.mubr.msk.f32.gmra.mrb[6].mxu0 %vm182_vm1, %v150_v13  ;;  %v443_v13 = vpop.permute.xlu1 %442 }
  0xc1   :  { %592 = vmatprep.mubr.msk.f32.mxu0 %vm722_vm0, %v723_v18 }
  0xc4   :  { %593 = vmatmul.mubr.msk.f32.gmra.mrb[8].mxu0 %vm182_vm1, %v151_v15 }
  0xc5   :  { %630 = vmatprep.mubr.msk.f32.mxu0 %vm722_vm0, %v723_v18 }
 0x187   :  { %v264_v16 = vpop.f32.mrb[0].mxu0 }
 0x188   :  { %v582_v19 = vpop.f32.mrb[1].mxu0  ;;  %v265_v20 = vadd.f32 %v264_v16, %v160_v17 }
 0x18a   :  { %675 = vtanh.f32 %v265_v20 }
 0x18b   :  { %v269_v22 = vpop.f32.mrb[2].mxu0 }
 0x18c   :  { %v270_v23 = vadd.f32 %v269_v22, %v165_v21  ;;  %v585_v24 = vpop.f32.mrb[3].mxu0 }
 0x18e   :  { %677 = vtanh.f32 %v270_v23 }
 0x18f   :  { %v274_v25 = vpop.f32.mrb[4].mxu0 }
 0x190   :  { %v588_v27 = vpop.f32.mrb[5].mxu0  ;;  %v275_v28 = vadd.f32 %v274_v25, %v170_v26 }
 0x192   :  { %679 = vtanh.f32 %v275_v28 }
 0x193   :  { %v279_v30 = vpop.f32.mrb[6].mxu0 }
 0x194   :  { %v280_v31 = vadd.f32 %v279_v30, %v175_v29  ;;  %v591_v32 = vpop.f32.mrb[7].mxu0  ;;  %v676_v33 = vpop.eup %675 }
 0x196   :  { %681 = vtanh.f32 %v280_v31 }
 0x197   :  { %v284_v35 = vpop.f32.mrb[8].mxu0 }
 0x198   :  { %v678_v36 = vpop.eup %677  ;;  %v285_v37 = vadd.f32 %v284_v35, %v180_v34  ;;  %v594_v38 = vpop.f32.mrb[9].mxu0 }
 0x199   :  { %v640_v39 = vpack.c.bf16 %v678_v36, %v676_v33 }
 0x19a   :  { %683 = vtanh.f32 %v285_v37 }
 0x19b   :  { %641 = vmatpush3.bf16.msra.mxu1 %v640_v39 }
 0x19c   :  { %642 = vmatprep.subr.bf16.mxu1 %v721_v14  ;;  %v680_v40 = vpop.eup %679 }
 0x1a0   :  { %v682_v41 = vpop.eup %681 }
 0x1a1   :  { %v643_v42 = vpack.c.bf16 %v682_v41, %v680_v40 }
 0x1a3   :  { %644 = vmatpush3.bf16.msra.mxu1 %v643_v42 }
 0x1a4   :  { %603 = vmatprep.subr.mxu1 %v723_v18  ;;  %v684_v44 = vpop.eup %683 }
 0x1a7   :  { %604 = vmatpush3.msra.mxu1 %v684_v44 }
 0x1a8   :  { %606 = vmatmul.mubr.msk.f32.vlgmr.msra.gmra.mrb[0].mxu1 %vm182_vm1, %v293_v43 }
 0x1a9   :  { %608 = vmatprep.mubr.msk.f32.mxu1 %vm722_vm0, %v723_v18 }
 0x1ac   :  { %609 = vmatmul.mubr.msk.f32.gmra.mrb[2].mxu1 %vm182_vm1, %v294_v45 }
 0x1ad   :  { %611 = vmatprep.mubr.msk.f32.mxu1 %vm722_vm0, %v723_v18 }
 0x1b0   :  { %612 = vmatmul.mubr.msk.f32.gmra.mrb[4].mxu1 %vm182_vm1, %v295_v46 }
 0x1b1   :  { %614 = vmatprep.mubr.msk.f32.mxu1 %vm722_vm0, %v723_v18 }
 0x1b4   :  { %615 = vmatmul.mubr.msk.f32.gmra.mrb[6].mxu1 %vm182_vm1, %v296_v47 }
 0x1b5   :  { %617 = vmatprep.mubr.msk.f32.mxu1 %vm722_vm0, %v723_v18 }
 0x1b8   :  { %618 = vmatmul.mubr.msk.f32.gmra.mrb[8].mxu1 %vm182_vm1, %v297_v48 }
 0x27b   :  { %v409_v49 = vpop.f32.mrb[0].mxu1 }
 0x27c   :  { %v607_v51 = vpop.f32.mrb[1].mxu1  ;;  %v410_v52 = vadd.f32 %v409_v49, %v306_v50 }
 0x27e   :  { %685 = vtanh.f32 %v410_v52 }
 0x27f   :  { %v414_v54 = vpop.f32.mrb[2].mxu1 }
 0x280   :  { %v415_v55 = vadd.f32 %v414_v54, %v311_v53  ;;  %v610_v56 = vpop.f32.mrb[3].mxu1 }
 0x282   :  { %687 = vtanh.f32 %v415_v55 }
 0x283   :  { %v419_v57 = vpop.f32.mrb[4].mxu1 }
 0x284   :  { %v613_v59 = vpop.f32.mrb[5].mxu1  ;;  %v420_v60 = vadd.f32 %v419_v57, %v316_v58 }
 0x286   :  { %689 = vtanh.f32 %v420_v60 }
 0x287   :  { %v424_v62 = vpop.f32.mrb[6].mxu1 }
 0x288   :  { %v425_v63 = vadd.f32 %v424_v62, %v321_v61  ;;  %v616_v0 = vpop.f32.mrb[7].mxu1  ;;  %v686_v1 = vpop.eup %685 }
 0x28a   :  { %691 = vtanh.f32 %v425_v63 }
 0x28b   :  { %v429_v3 = vpop.f32.mrb[8].mxu1 }
 0x28c   :  { %v688_v4 = vpop.eup %687  ;;  %v430_v5 = vadd.f32 %v429_v3, %v326_v2  ;;  %v619_v6 = vpop.f32.mrb[9].mxu1 }
 0x28d   :  { %v646_v7 = vpack.c.bf16 %v688_v4, %v686_v1 }
 0x28e   :  { %693 = vtanh.f32 %v430_v5 }
 0x28f   :  { %647 = vmatpush3.bf16.msra.mxu0 %v646_v7 }
 0x290   :  { %648 = vmatprep.subr.bf16.mxu0 %v721_v14  ;;  %v690_v8 = vpop.eup %689 }
 0x294   :  { %v692_v9 = vpop.eup %691 }
 0x295   :  { %v649_v10 = vpack.c.bf16 %v692_v9, %v690_v8 }
 0x297   :  { %650 = vmatpush3.bf16.msra.mxu0 %v649_v10 }
 0x298   :  { %628 = vmatprep.subr.mxu0 %v723_v18  ;;  %v694_v12 = vpop.eup %693 }
 0x29b   :  { %629 = vmatpush3.msra.mxu0 %v694_v12 }
 0x29c   :  { %631 = vmatmul.mubr.msk.f32.vlgmr.msra.gmra.mrb[10].mxu0 %vm182_vm1, %v438_v11 }
 0x36f   :  { %v514_v15 = vpop.f32.mrb[10].mxu0 }
 0x370   :  { %v515_v16 = vadd.f32 %v514_v15, %v443_v13  ;;  %v632_v14 = vpop.f32.mrb[11].mxu0 }
 0x372   :  { %518 = vst [vmem:[#allocation2] sm:$0xff] %v515_v16 }
 0x373   :  { %706 = shalt.err (!%p703_p4)
}
 0x374   :  { %s707_s27 = scalar_lea.hbm %s937_s9, 128 }
 0x375   :  { %p708_p5 = scmp.ne.s32.totalorder %s937_s9, %s707_s27  ;;  %p711_p6 = scmp.lt.u32.totalorder %s707_s27, %s937_s9 }
 0x377   :  { %p713_p7 = pnand %p711_p6, %p708_p5 }
 0x379   :  { %716 = shalt.err (!%p713_p7)
}
 0x37a   :  { %528 = dma.vmem_to_hbm [thread:$0]  %s526_s24, 128, %s937_s9, [#allocation3]  }
 0x37b   :  { %717 = dma.done.wait [#allocation3], 128  }
 0x37c   :  { %718 = vsyncadd [#allocation3], 4294967168 }
 0x37d   :  { %532 = vsyncpa [#allocation3], 1 }

</bundles_post_ra>
